<compile_context>
chip_gen: v7x
topology: tpu7x:2x2x1
jax: 0.10.0
libtpu: 0.0.40
codegen_flags: <defaults>
</compile_context>

<pallas_src>
import jax
import jax.numpy as jnp
from jax import lax
from jax.experimental import pallas as pl
from jax.experimental.pallas import tpu as pltpu


def _round_up(x, m):
    return (x + m - 1) // m * m


def _pick_tiles(B, L, H, target_bytes=8 * 1024 * 1024):
    """Pick (tb, tl) so the streamed bf16 emb block is ~4-8 MiB.

    tb is capped at 32 (keeps >=2 batch tiles for v7x megacore at moderate
    batch sizes and bounds VMEM); tl is a multiple of 128 capped at the padded
    sequence length.
    """
    tb = min(32, _round_up(B, 8))
    tl = max(128, (target_bytes // (tb * H * 2)) // 128 * 128)
    tl = min(tl, _round_up(L, 128))
    return tb, tl


def bert_classifier_kernel(vlen_ref, emb_ref, wp_ref, bp_ref, wc_ref, bc_ref,
                           logits_ref, acc_ref):
    """One (batch-tile, seq-tile) grid step.

    vlen_ref   : VMEM (TB, 1)  int32        valid lengths for this batch tile
    emb_ref    : VMEM (TB, TL, H) bfloat16  streamed embedding tile
    wp_ref     : VMEM (H, H)   bfloat16     pooler dense weight     (resident)
    bp_ref     : VMEM (1, H)   float32      pooler dense bias       (resident)
    wc_ref     : VMEM (H, Cp)  bfloat16     classifier weight, lane-padded
    bc_ref     : VMEM (1, Cp)  float32      classifier bias,   lane-padded
    logits_ref : VMEM (TB, Cp) float32      output block (resident over L axis)
    acc_ref    : VMEM (TB, H)  float32      pooled-sum accumulator scratch
    """
    l = pl.program_id(1)
    TB, TL, H = emb_ref.shape

    @pl.when(l == 0)
    def _init():
        acc_ref[...] = jnp.zeros_like(acc_ref)

    # --- gen_attention_mask as a block-diagonal MXU mask ----------------------
    # mask[i, j] = 1  iff column j belongs to batch-row i's TL-chunk and its
    # global sequence position is < valid_length[i].  Built without div/mod:
    #   i*TL <= j < i*TL + clamp(vlen[i] - l*TL, 0, TL)
    vlen = vlen_ref[...]                                          # (TB, 1) int32
    row = lax.broadcasted_iota(jnp.int32, (TB, TB * TL), 0)
    col = lax.broadcasted_iota(jnp.int32, (TB, TB * TL), 1)
    lo = row * TL
    lim = jnp.clip(vlen - l * TL, 0, TL)                          # (TB, 1)
    mask = ((col >= lo) & (col < lo + lim)).astype(jnp.bfloat16)  # (TB, TB*TL)

    # --- masked-sum contribution of this seq tile, on the MXU (f32 acc) -------
    emb2d = emb_ref[...].reshape(TB * TL, H)                      # free merge
    acc_ref[...] += jnp.dot(mask, emb2d, preferred_element_type=jnp.float32)

    # --- finalize: synthetic pooler (masked mean -> dense -> tanh) + classifier
    @pl.when(l == pl.num_programs(1) - 1)
    def _finalize():
        denom = jnp.maximum(vlen.astype(jnp.float32), 1.0)        # (TB, 1)
        pooled = acc_ref[...] / denom                             # (TB, H) f32
        pooler = jnp.tanh(
            jnp.dot(pooled.astype(jnp.bfloat16), wp_ref[...],
                    preferred_element_type=jnp.float32) + bp_ref[...])
        # TODO(synk): nn.Dropout(p=dr_rate) is identity at inference; not applied.
        logits_ref[...] = (
            jnp.dot(pooler.astype(jnp.bfloat16), wc_ref[...],
                    preferred_element_type=jnp.float32) + bc_ref[...])


def bert_classifier_forward(token_ids, valid_length, segment_ids, params,
                            *, tb=None, tl=None):
    tok_emb, seg_emb = params["tok_emb"], params["seg_emb"]
    B, L = token_ids.shape
    H = tok_emb.shape[1]
    C = params["wc"].shape[1]

    if tb is None or tl is None:
        tb0, tl0 = _pick_tiles(B, L, H)
        tb = tb or tb0
        tl = tl or tl0

    # TODO(synk): fuse this embedding gather into the kernel (token_ids /
    # segment_ids scalar-prefetched to SMEM, tok_emb/seg_emb left in HBM via
    # BlockSpec(memory_space=pl.ANY), batched row-gather DMA per (tb, tl) tile)
    # to remove the [B, L, H] HBM round-trip.  Until then the tables are cast
    # to bf16 *before* the gather so the fused gather+add reads half the bytes,
    # and the kernel streams bf16.
    emb = (tok_emb.astype(jnp.bfloat16)[token_ids]
           + seg_emb.astype(jnp.bfloat16)[segment_ids])

    # Pad: batch -> multiple of tb, seq -> multiple of tl, classes -> 128 lanes
    # (lane-dense unmasked store of the output block).
    B_pad = _round_up(B, tb)
    L_pad = _round_up(L, tl)
    C_pad = _round_up(C, 128)

    emb = jnp.pad(emb, ((0, B_pad - B), (0, L_pad - L), (0, 0)))
    vlen = jnp.pad(valid_length.astype(jnp.int32),
                   (0, B_pad - B)).reshape(B_pad, 1)              # pads: vlen=0
    wp = params["wp"].astype(jnp.bfloat16)
    bp = params["bp"].astype(jnp.float32)
    wc = jnp.pad(params["wc"], ((0, 0), (0, C_pad - C))).astype(jnp.bfloat16)
    bc = jnp.pad(params["bc"], ((0, 0), (0, C_pad - C))).astype(jnp.float32)

    grid = (B_pad // tb, L_pad // tl)

    # Grid-invariant weights/biases: constant index map -> no prefetch overlap
    # needed, single buffer frees VMEM (matters most on v7x's 64 MiB).
    def _resident(shape):
        return pl.BlockSpec(shape, lambda b, l: (0, 0),
                            pipeline_mode=pl.Buffered(1))

    logits_padded = pl.pallas_call(
        bert_classifier_kernel,
        out_shape=jax.ShapeDtypeStruct((B_pad, C_pad), jnp.float32),
        grid_spec=pltpu.PrefetchScalarGridSpec(
            num_scalar_prefetch=0,
            grid=grid,
            in_specs=[
                pl.BlockSpec((tb, 1), lambda b, l: (b, 0)),        # valid_length
                # emb stream: default double-buffered; bump to pl.Buffered(3)
                # only if a profile shows exposed DMA at batch-tile boundaries.
                pl.BlockSpec((tb, tl, H), lambda b, l: (b, l, 0)),
                _resident((H, H)),        # wp
                _resident((1, H)),        # bp
                _resident((H, C_pad)),    # wc
                _resident((1, C_pad)),    # bc
            ],
            out_specs=pl.BlockSpec((tb, C_pad), lambda b, l: (b, 0)),
            scratch_shapes=[pltpu.VMEM((tb, H), jnp.float32)],
        ),
        compiler_params=pltpu.CompilerParams(
            # batch axis parallel (v7x megacore), seq axis is the reduction.
            dimension_semantics=("parallel", "arbitrary"),
            # 48 MiB scoped VMEM: fits v5e/v6e/v7x; tiles are sized to ~8 MiB so
            # double-buffered emb + resident weights stay well under this.
            vmem_limit_bytes=48 * 1024 * 1024),
    )(vlen, emb, wp, bp, wc, bc)

    return logits_padded[:B, :C]


if __name__ == "__main__":
    # Small demo shapes (real BERT: H=768, L=512, large vocab).
    B, L, H, C, V = 2, 128, 128, 5, 64

    key = jax.random.PRNGKey(0)
    k1, k2, k3, k4, k5 = jax.random.split(key, 5)
    params = {
        "tok_emb": jax.random.normal(k1, (V, H), jnp.float32) * 0.02,
        "seg_emb": jax.random.normal(k2, (2, H), jnp.float32) * 0.02,
        "wp": jax.random.normal(k3, (H, H), jnp.float32) * 0.02,   # pooler dense
        "bp": jnp.zeros((1, H), jnp.float32),
        "wc": jax.random.normal(k4, (H, C), jnp.float32) * 0.02,   # classifier
        "bc": jnp.zeros((1, C), jnp.float32),
    }

    token_ids = jax.random.randint(k5, (B, L), 0, V, dtype=jnp.int32)
    valid_length = jnp.array([37, 100], dtype=jnp.int32)
    segment_ids = jnp.zeros((B, L), dtype=jnp.int32)

    logits = bert_classifier_forward(token_ids, valid_length, segment_ids, params)
    jax.block_until_ready(logits)
    assert logits.shape == (B, C) and logits.dtype == jnp.float32
    print("KERNEL_OK")
</pallas_src>

<mosaic_0001>
module attributes {stable_mosaic.version = 11 : i64} {
  func.func @bert_classifier_kernel(%arg0: i32, %arg1: i32, %arg2: memref<8x1xi32, #tpu.memory_space<vmem>>, %arg3: memref<8x128x128xbf16, #tpu.memory_space<vmem>>, %arg4: memref<128x128xbf16, #tpu.memory_space<vmem>>, %arg5: memref<1x128xf32, #tpu.memory_space<vmem>>, %arg6: memref<128x128xbf16, #tpu.memory_space<vmem>>, %arg7: memref<1x128xf32, #tpu.memory_space<vmem>>, %arg8: memref<8x128xf32, #tpu.memory_space<vmem>>, %arg9: memref<8x128xf32, #tpu.memory_space<vmem>>) attributes {dimension_semantics = [#tpu.dimension_semantics<parallel>, #tpu.dimension_semantics<arbitrary>], iteration_bounds = array<i64: 1, 1>, scalar_prefetch = 0 : i64, scratch_operands = 1 : i64, tpu.core_type = #tpu.core_type<tc>, window_params = [{transform_indices = @transform_0, window_bounds = array<i64: 8, 1>}, {transform_indices = @transform_1, window_bounds = array<i64: 8, 128, 128>}, {pipeline_mode = #tpu.pipeline_mode<synchronous>, transform_indices = @transform_2, window_bounds = array<i64: 128, 128>}, {pipeline_mode = #tpu.pipeline_mode<synchronous>, transform_indices = @transform_3, window_bounds = array<i64: 1, 128>}, {pipeline_mode = #tpu.pipeline_mode<synchronous>, transform_indices = @transform_4, window_bounds = array<i64: 128, 128>}, {pipeline_mode = #tpu.pipeline_mode<synchronous>, transform_indices = @transform_5, window_bounds = array<i64: 1, 128>}, {transform_indices = @transform_6, window_bounds = array<i64: 8, 128>}]} {
    %c0_i32 = arith.constant 0 : i32
    %0 = arith.cmpi eq, %arg1, %c0_i32 : i32
    %1 = arith.extui %0 : i1 to i32
    %c0_i32_0 = arith.constant 0 : i32
    %2 = arith.cmpi ne, %1, %c0_i32_0 : i32
    scf.if %2 {
      %cst_14 = arith.constant 0.000000e+00 : f32
      %32 = vector.broadcast %cst_14 : f32 to vector<8x128xf32>
      %c0_15 = arith.constant 0 : index
      %c0_16 = arith.constant 0 : index
      %33 = vector.load %arg9[%c0_15, %c0_16] : memref<8x128xf32, #tpu.memory_space<vmem>>, vector<8x128xf32>
      tpu.vector_store %arg9[%c0_15, %c0_16], %32 {strides = array<i32>} : memref<8x128xf32, #tpu.memory_space<vmem>>, vector<8x128xf32>,
    } else {
    }
    %c0 = arith.constant 0 : index
    %c0_1 = arith.constant 0 : index
    %3 = vector.load %arg2[%c0, %c0_1] : memref<8x1xi32, #tpu.memory_space<vmem>>, vector<8x1xi32>
    %4 = tpu.iota {dimensions = array<i32: 0>} : vector<8x1024xi32>
    %5 = tpu.iota {dimensions = array<i32: 1>} : vector<8x1024xi32>
    %c128_i32 = arith.constant 128 : i32
    %6 = vector.broadcast %c128_i32 : i32 to vector<8x1024xi32>
    %7 = arith.muli %4, %6 : vector<8x1024xi32>
    %c128_i32_2 = arith.constant 128 : i32
    %8 = arith.muli %arg1, %c128_i32_2 : i32
    %9 = vector.broadcast %8 : i32 to vector<8x1xi32>
    %10 = arith.subi %3, %9 : vector<8x1xi32>
    %c0_i32_3 = arith.constant 0 : i32
    %c128_i32_4 = arith.constant 128 : i32
    %11 = vector.broadcast %c0_i32_3 : i32 to vector<8x1xi32>
    %12 = arith.maxsi %11, %10 : vector<8x1xi32>
    %13 = vector.broadcast %c128_i32_4 : i32 to vector<8x1xi32>
    %14 = arith.minsi %13, %12 : vector<8x1xi32>
    %15 = arith.cmpi sge, %5, %7 : vector<8x1024xi32>
    %16 = vector.broadcast %14 : vector<8x1xi32> to vector<8x1024xi32>
    %17 = arith.addi %7, %16 : vector<8x1024xi32>
    %18 = arith.cmpi slt, %5, %17 : vector<8x1024xi32>
    %19 = arith.andi %15, %18 : vector<8x1024xi1>
    %20 = arith.extui %19 : vector<8x1024xi1> to vector<8x1024xi32>
    %21 = arith.sitofp %20 : vector<8x1024xi32> to vector<8x1024xf32>
    %22 = arith.truncf %21 : vector<8x1024xf32> to vector<8x1024xbf16>
    %c0_5 = arith.constant 0 : index
    %c0_6 = arith.constant 0 : index
    %c0_7 = arith.constant 0 : index
    %23 = vector.load %arg3[%c0_5, %c0_6, %c0_7] : memref<8x128x128xbf16, #tpu.memory_space<vmem>>, vector<8x128x128xbf16>
    %24 = vector.shape_cast %23 : vector<8x128x128xbf16> to vector<1024x128xbf16>
    %c0_8 = arith.constant 0 : index
    %c0_9 = arith.constant 0 : index
    %25 = vector.load %arg9[%c0_8, %c0_9] : memref<8x128xf32, #tpu.memory_space<vmem>>, vector<8x128xf32>
    %cst = arith.constant dense<0.000000e+00> : vector<8x128xf32>
    %26 = tpu.matmul %22, %24, %cst {dimension_numbers = #tpu.dot_dimension_numbers<[1], [0], [0], [1], [0, 0, 1, 1], [], []>} : vector<8x1024xbf16>, vector<1024x128xbf16>, vector<8x128xf32> -> vector<8x128xf32>
    %27 = arith.addf %25, %26 : vector<8x128xf32>
    %c0_10 = arith.constant 0 : index
    %c0_11 = arith.constant 0 : index
    %28 = vector.load %arg9[%c0_10, %c0_11] : memref<8x128xf32, #tpu.memory_space<vmem>>, vector<8x128xf32>
    tpu.vector_store %arg9[%c0_10, %c0_11], %27 {strides = array<i32>} : memref<8x128xf32, #tpu.memory_space<vmem>>, vector<8x128xf32>,
    %c0_i32_12 = arith.constant 0 : i32
    %29 = arith.cmpi eq, %arg1, %c0_i32_12 : i32
    %30 = arith.extui %29 : i1 to i32
    %c0_i32_13 = arith.constant 0 : i32
    %31 = arith.cmpi ne, %30, %c0_i32_13 : i32
    scf.if %31 {
      %32 = arith.sitofp %3 : vector<8x1xi32> to vector<8x1xf32>
      %cst_14 = arith.constant 1.000000e+00 : f32
      %33 = vector.broadcast %cst_14 : f32 to vector<8x1xf32>
      %34 = arith.maximumf %32, %33 : vector<8x1xf32>
      %c0_15 = arith.constant 0 : index
      %c0_16 = arith.constant 0 : index
      %35 = vector.load %arg9[%c0_15, %c0_16] : memref<8x128xf32, #tpu.memory_space<vmem>>, vector<8x128xf32>
      %36 = vector.broadcast %34 : vector<8x1xf32> to vector<8x128xf32>
      %37 = arith.divf %35, %36 : vector<8x128xf32>
      %38 = arith.truncf %37 : vector<8x128xf32> to vector<8x128xbf16>
      %c0_17 = arith.constant 0 : index
      %c0_18 = arith.constant 0 : index
      %39 = vector.load %arg4[%c0_17, %c0_18] : memref<128x128xbf16, #tpu.memory_space<vmem>>, vector<128x128xbf16>
      %cst_19 = arith.constant dense<0.000000e+00> : vector<8x128xf32>
      %40 = tpu.matmul %38, %39, %cst_19 {dimension_numbers = #tpu.dot_dimension_numbers<[1], [0], [0], [1], [0, 0, 1, 1], [], []>} : vector<8x128xbf16>, vector<128x128xbf16>, vector<8x128xf32> -> vector<8x128xf32>
      %c0_20 = arith.constant 0 : index
      %c0_21 = arith.constant 0 : index
      %41 = vector.load %arg5[%c0_20, %c0_21] : memref<1x128xf32, #tpu.memory_space<vmem>>, vector<1x128xf32>
      %42 = vector.broadcast %41 : vector<1x128xf32> to vector<8x128xf32>
      %43 = arith.addf %40, %42 : vector<8x128xf32>
      %44 = math.tanh %43 : vector<8x128xf32>
      %45 = arith.truncf %44 : vector<8x128xf32> to vector<8x128xbf16>
      %c0_22 = arith.constant 0 : index
      %c0_23 = arith.constant 0 : index
      %46 = vector.load %arg6[%c0_22, %c0_23] : memref<128x128xbf16, #tpu.memory_space<vmem>>, vector<128x128xbf16>
      %cst_24 = arith.constant dense<0.000000e+00> : vector<8x128xf32>
      %47 = tpu.matmul %45, %46, %cst_24 {dimension_numbers = #tpu.dot_dimension_numbers<[1], [0], [0], [1], [0, 0, 1, 1], [], []>} : vector<8x128xbf16>, vector<128x128xbf16>, vector<8x128xf32> -> vector<8x128xf32>
      %c0_25 = arith.constant 0 : index
      %c0_26 = arith.constant 0 : index
      %48 = vector.load %arg7[%c0_25, %c0_26] : memref<1x128xf32, #tpu.memory_space<vmem>>, vector<1x128xf32>
      %49 = vector.broadcast %48 : vector<1x128xf32> to vector<8x128xf32>
      %50 = arith.addf %47, %49 : vector<8x128xf32>
      %c0_27 = arith.constant 0 : index
      %c0_28 = arith.constant 0 : index
      %51 = vector.load %arg8[%c0_27, %c0_28] : memref<8x128xf32, #tpu.memory_space<vmem>>, vector<8x128xf32>
      tpu.vector_store %arg8[%c0_27, %c0_28], %50 {strides = array<i32>} : memref<8x128xf32, #tpu.memory_space<vmem>>, vector<8x128xf32>,
    } else {
    }
    return
  }
  func.func @transform_0(%arg0: i32, %arg1: i32) -> (i32, i32) {
    %c0_i32 = arith.constant 0 : i32
    %c0_i32_0 = arith.constant 0 : i32
    return %arg0, %c0_i32 : i32, i32
  }
  func.func @transform_1(%arg0: i32, %arg1: i32) -> (i32, i32, i32) {
    %c0_i32 = arith.constant 0 : i32
    %c0_i32_0 = arith.constant 0 : i32
    return %arg0, %arg1, %c0_i32 : i32, i32, i32
  }
  func.func @transform_2(%arg0: i32, %arg1: i32) -> (i32, i32) {
    %c0_i32 = arith.constant 0 : i32
    %c0_i32_0 = arith.constant 0 : i32
    %c0_i32_1 = arith.constant 0 : i32
    return %c0_i32, %c0_i32_0 : i32, i32
  }
  func.func @transform_3(%arg0: i32, %arg1: i32) -> (i32, i32) {
    %c0_i32 = arith.constant 0 : i32
    %c0_i32_0 = arith.constant 0 : i32
    %c0_i32_1 = arith.constant 0 : i32
    return %c0_i32, %c0_i32_0 : i32, i32
  }
  func.func @transform_4(%arg0: i32, %arg1: i32) -> (i32, i32) {
    %c0_i32 = arith.constant 0 : i32
    %c0_i32_0 = arith.constant 0 : i32
    %c0_i32_1 = arith.constant 0 : i32
    return %c0_i32, %c0_i32_0 : i32, i32
  }
  func.func @transform_5(%arg0: i32, %arg1: i32) -> (i32, i32) {
    %c0_i32 = arith.constant 0 : i32
    %c0_i32_0 = arith.constant 0 : i32
    %c0_i32_1 = arith.constant 0 : i32
    return %c0_i32, %c0_i32_0 : i32, i32
  }
  func.func @transform_6(%arg0: i32, %arg1: i32) -> (i32, i32) {
    %c0_i32 = arith.constant 0 : i32
    %c0_i32_0 = arith.constant 0 : i32
    return %arg0, %c0_i32 : i32, i32
  }
}

</mosaic_0001>

<bundles_post_ra>
// kernel: tpu_custom_call.1
= control target key start
LH: loop header
LB: loop body
LE: loop exit
PB: predicated region body
PF: predicated region fallthrough
CT: control target
= control target key end

     0   :  { %11 = vsyncpa [#allocation4], 0  ;;  %s1690_s0 = inlined_call_operand.vmem [shape: s32[8,1], index: 0, kind: input, shape index: {}]   ;;  %s1691_s1 = inlined_call_operand.hbm [shape: bf16[8,128,128], index: 1, kind: input, shape index: {}]   ;;  %s1692_s2 = inlined_call_operand.hbm [shape: bf16[128,128], index: 2, kind: input, shape index: {}]   ;;  %s1693_s3 = inlined_call_operand.vmem [shape: f32[1,128], index: 3, kind: input, shape index: {}]   ;;  %s1694_s4 = inlined_call_operand.hbm [shape: bf16[128,128], index: 4, kind: input, shape index: {}]   ;;  %s1695_s5 = inlined_call_operand.vmem [shape: f32[1,128], index: 5, kind: input, shape index: {}]   ;;  %s1696_s6 = inlined_call_operand.hbm [shape: f32[8,128], index: 6, kind: output, shape index: {}]  }
   0x1   :  { %12 = vsyncpa [#allocation7], 0 }
   0x2   :  { %13 = vsyncpa [#allocation5], 0  ;;  %s1514_s21 = smov [#allocation6]   ;;  %s1515_s23 = smov [#allocation3]  }
   0x3   :  { %s33_s22 = sshll.u32 %s1514_s21, 4  ;;  %s21_s24 = sshll.u32 %s1515_s23, 4  ;;  %s34_s22 = int_to_ptr.vmem [resolvable:$true] %s33_s22  ;;  %s1559_s24 = int_to_ptr.vmem [resolvable:$true] %s21_s24 }
   0x4   :  { %s1420_s27 = scalar_lea.hbm %s1692_s2, 1024 }
   0x5   :  { %p1421_p0 = scmp.ne.s32.totalorder %s1692_s2, %s1420_s27  ;;  %p1424_p1 = scmp.lt.u32.totalorder %s1420_s27, %s1692_s2 }
   0x7   :  { %p1426_p2 = pnand %p1424_p1, %p1421_p0 }
   0x9   :  { %1429 = shalt.err (!%p1426_p2)
}
   0xa   :  { %s1430_s8 = scalar_lea.vmem %s34_s22, 1024  ;;  %p1435_p4 = scmp.lt.s32.totalorder %s34_s22, %s34_s22 }
   0xb   :  { %p1431_p3 = scmp.ne.s32.totalorder %s34_s22, %s1430_s8  ;;  %p1436_p5 = scmp.lt.s32.totalorder %s1430_s8, %s1430_s8 }
   0xd   :  { %p1437_p6 = por %p1436_p5, %p1435_p4 }
   0xf   :  { %p1438_p7 = pnand %p1437_p6, %p1431_p3 }
  0x11   :  { %1441 = shalt.err (!%p1438_p7)
}
  0x12   :  { %s1516_s9 = smov 64   ;;  %s1517_s10 = smov 4  }
  0x13   :  { %39 = dma.hbm_to_vmem [thread:$0]  %s1692_s2, 1024, %s34_s22, [#allocation7], %s1516_s9, %s1516_s9, %s1517_s10  }
  0x14   :  { %s1442_s15 = scalar_lea.hbm %s1691_s1, 8192 }
  0x15   :  { %p1443_p8 = scmp.ne.s32.totalorder %s1691_s1, %s1442_s15  ;;  %p1446_p9 = scmp.lt.u32.totalorder %s1442_s15, %s1691_s1 }
  0x17   :  { %p1448_p10 = pnand %p1446_p9, %p1443_p8 }
  0x19   :  { %1451 = shalt.err (!%p1448_p10)
}
  0x1a   :  { %s1452_s20 = scalar_lea.vmem %s1559_s24, 8192  ;;  %p1457_p12 = scmp.lt.s32.totalorder %s1559_s24, %s1559_s24 }
  0x1b   :  { %p1453_p11 = scmp.ne.s32.totalorder %s1559_s24, %s1452_s20  ;;  %p1458_p13 = scmp.lt.s32.totalorder %s1452_s20, %s1452_s20 }
  0x1d   :  { %p1459_p0 = por %p1458_p13, %p1457_p12 }
  0x1f   :  { %p1460_p1 = pnand %p1459_p0, %p1453_p11 }
  0x21   :  { %1463 = shalt.err (!%p1460_p1)
}
  0x22   :  { %27 = dma.hbm_to_vmem [thread:$0]  %s1691_s1, 8192, %s1559_s24, [#allocation4], %s1516_s9, %s1516_s9, %s1517_s10  }
  0x23   :  { %s1518_s22 = smov [#allocation8]   ;;  %s1464_s27 = scalar_lea.hbm %s1694_s4, 1024 }
  0x24   :  { %s47_s23 = sshll.u32 %s1518_s22, 4  ;;  %p1465_p2 = scmp.ne.s32.totalorder %s1694_s4, %s1464_s27  ;;  %s48_s23 = int_to_ptr.vmem [resolvable:$true] %s47_s23 }
  0x25   :  { %p1468_p3 = scmp.lt.u32.totalorder %s1464_s27, %s1694_s4 }
  0x27   :  { %p1470_p4 = pnand %p1468_p3, %p1465_p2 }
  0x29   :  { %1473 = shalt.err (!%p1470_p4)
}
  0x2a   :  { %s1474_s8 = scalar_lea.vmem %s48_s23, 1024  ;;  %p1479_p6 = scmp.lt.s32.totalorder %s48_s23, %s48_s23 }
  0x2b   :  { %p1475_p5 = scmp.ne.s32.totalorder %s48_s23, %s1474_s8  ;;  %p1480_p7 = scmp.lt.s32.totalorder %s1474_s8, %s1474_s8 }
  0x2d   :  { %p1481_p8 = por %p1480_p7, %p1479_p6 }
  0x2f   :  { %p1482_p9 = pnand %p1481_p8, %p1475_p5 }
  0x31   :  { %1485 = shalt.err (!%p1482_p9)
}
  0x32   :  { %53 = dma.hbm_to_vmem [thread:$0]  %s1694_s4, 1024, %s48_s23, [#allocation7], %s1516_s9, %s1516_s9, %s1517_s10  }
  0x33   :  { %1508 = dma.done.wait [#allocation4], 8192  }
  0x34   :  { %1509 = vsyncadd [#allocation4], 4294959104 }
  0x35   :  { %1510 = dma.done.wait [#allocation7], 2048  }
  0x36   :  { %1511 = vsyncadd [#allocation7], 4294965248  ;;  %v1519_v0 = vmov 0   ;;  %v71_v1 = vld [vmem:[%s1690_s0] sm:$0xff]  ;;  %v1340_v10 = vld [vmem:[#allocation3 + $0x48] sm:$0xff]   ;;  %v72_v40 = vlaneseq  ;;  %s1523_s13 = smov [#allocation9]  }
  0x37   :  { %1335 = vset.pattern.permute.xlu0 %v1519_v0  ;;  %vm87_vm0 = vcmp.gt.s32.totalorder %v71_v1, 0  ;;  %v821_v2 = vcvt.s32.f32 %v71_v1  ;;  %v1336_v3 = vld [vmem:[#allocation3 + $0x40] sm:$0xff]   ;;  %v1341_v11 = vld [vmem:[#allocation3 + $0xc8] sm:$0xff]   ;;  %v1344_v14 = vld [vmem:[#allocation3 + $0x50] sm:$0xff]   ;;  %v1520_v50 = vmov 1.0|1.0  }
  0x38   :  { %v88_v4 = vsel %vm87_vm0, %v71_v1, 0  ;;  %v1337_v5 = vld [vmem:[#allocation3 + $0xc0] sm:$0xff]   ;;  %1179 = vmatprep.subr.bf16.mxu0 %v1336_v3  ;;  %v1342_v12 = vld [vmem:[#allocation3 + $0x8] sm:$0xff]   ;;  %v1345_v15 = vld [vmem:[#allocation3 + $0xd0] sm:$0xff]   ;;  %v73_v41 = vshrl.u32 %v72_v40, 7  ;;  %v1614_v42 = vand.u32 127, %v72_v40 }
  0x39   :  { %vm89_vm1 = vcmp.lt.s32.totalorder %v88_v4, 128  ;;  %v822_v6 = vmax.f32 %v821_v2, 1.0  ;;  %v1338_v7 = vld [vmem:[#allocation3] sm:$0xff]   ;;  %1201 = vmatprep.subr.bf16.mxu1 %v1337_v5  ;;  %v1343_v13 = vld [vmem:[#allocation3 + $0x88] sm:$0xff]   ;;  %v1346_v16 = vld [vmem:[#allocation3 + $0x10] sm:$0xff]   ;;  %s1063_s14 = sshll.u32 %s1523_s13, 4  ;;  %s1064_s14 = int_to_ptr.vmem [resolvable:$true] %s1063_s14 }
  0x3a   :  { %v1339_v8 = vld [vmem:[#allocation3 + $0x80] sm:$0xff]   ;;  %v90_v9 = vsel %vm89_vm1, %v88_v4, 128  ;;  %1180 = vmatpush3.bf16.msra.mxu0 %v1338_v7  ;;  %v1347_v17 = vld [vmem:[#allocation3 + $0x90] sm:$0xff]   ;;  %v1348_v18 = vld [vmem:[#allocation3 + $0x58] sm:$0xff]   ;;  %v1616_v43 = vmul.u32 128, %v73_v41  ;;  %v76_v44 = vadd.s32 128, %v1614_v42  ;;  %p1491_p11 = scmp.lt.s32.totalorder %s1064_s14, %s1064_s14 }
  0x3b   :  { %100 = vperm.xlu0 %1335, %v90_v9   ;;  %1202 = vmatpush3.bf16.msra.mxu1 %v1339_v8  ;;  %v1349_v19 = vld [vmem:[#allocation3 + $0xd8] sm:$0xff]   ;;  %v1352_v22 = vld [vmem:[#allocation3 + $0x60] sm:$0xff]   ;;  %v1356_v26 = vld [vmem:[#allocation3 + $0x68] sm:$0xff]   ;;  %v78_v45 = vadd.s32 384, %v1614_v42  ;;  %v77_v48 = vadd.s32 256, %v1614_v42  ;;  %v80_v49 = vadd.s32 640, %v1614_v42 }
  0x3c   :  { %1181 = vmatprep.subr.bf16.mxu0 %v1340_v10  ;;  %1203 = vmatprep.subr.bf16.mxu1 %v1341_v11  ;;  %v1350_v20 = vld [vmem:[#allocation3 + $0x18] sm:$0xff]   ;;  %v1353_v23 = vld [vmem:[#allocation3 + $0xe0] sm:$0xff]   ;;  %v1357_v27 = vld [vmem:[#allocation3 + $0xe8] sm:$0xff]   ;;  %vm92_vm2 = vcmp.ge.s32.totalorder %v76_v44, %v1616_v43  ;;  %vm91_vm8 = vcmp.ge.s32.totalorder %v1614_v42, %v1616_v43  ;;  %v82_v52 = vadd.s32 896, %v1614_v42 }
  0x3d   :  { %v1351_v21 = vld [vmem:[#allocation3 + $0x98] sm:$0xff]   ;;  %v1354_v24 = vld [vmem:[#allocation3 + $0x20] sm:$0xff]   ;;  %v1358_v28 = vld [vmem:[#allocation3 + $0x28] sm:$0xff]   ;;  %vm94_vm4 = vcmp.ge.s32.totalorder %v78_v45, %v1616_v43  ;;  %vm93_vm12 = vcmp.ge.s32.totalorder %v77_v48, %v1616_v43  ;;  %vm96_vm0 = vcmp.ge.s32.totalorder %v80_v49, %v1616_v43 }
  0x3e   :  { %1182 = vmatpush3.bf16.msra.mxu0 %v1342_v12  ;;  %v1355_v25 = vld [vmem:[#allocation3 + $0xa0] sm:$0xff]   ;;  %v1359_v29 = vld [vmem:[#allocation3 + $0xa8] sm:$0xff]   ;;  %v1360_v30 = vld [vmem:[#allocation3 + $0x70] sm:$0xff]  }
  0x3f   :  { %826 = vperm.xlu0 %1335, %v822_v6   ;;  %1204 = vmatpush3.bf16.msra.mxu1 %v1343_v13  ;;  %v1361_v31 = vld [vmem:[#allocation3 + $0xf0] sm:$0xff]   ;;  %v1364_v34 = vld [vmem:[#allocation3 + $0x78] sm:$0xff]   ;;  %v1368_v38 = vld [vmem:[#allocation3 + $0x140] sm:$0xff]   ;;  %v79_v13 = vadd.s32 512, %v1614_v42 }
  0x40   :  { %1183 = vmatprep.subr.bf16.mxu0 %v1344_v14  ;;  %1205 = vmatprep.subr.bf16.mxu1 %v1345_v15  ;;  %v1362_v32 = vld [vmem:[#allocation3 + $0x30] sm:$0xff]   ;;  %v1365_v35 = vld [vmem:[#allocation3 + $0xf8] sm:$0xff]   ;;  %v1369_v39 = vld [vmem:[#allocation3 + $0x1c0] sm:$0xff]  }
  0x41   :  { %v1363_v33 = vld [vmem:[#allocation3 + $0xb0] sm:$0xff]   ;;  %v1366_v36 = vld [vmem:[#allocation3 + $0x38] sm:$0xff]   ;;  %v1370_v51 = vld [vmem:[#allocation3 + $0x100] sm:$0xff]  }
  0x42   :  { %1184 = vmatpush3.bf16.msra.mxu0 %v1346_v16  ;;  %v1367_v37 = vld [vmem:[#allocation3 + $0xb8] sm:$0xff]   ;;  %v1372_v53 = vld [vmem:[#allocation3 + $0x148] sm:$0xff]   ;;  %v1371_v54 = vld [vmem:[#allocation3 + $0x180] sm:$0xff]   ;;  %v81_v16 = vadd.s32 768, %v1614_v42 }
  0x43   :  { %1206 = vmatpush3.bf16.msra.mxu1 %v1347_v17  ;;  %1185 = vmatprep.subr.bf16.mxu0 %v1348_v18  ;;  %v1373_v55 = vld [vmem:[#allocation3 + $0x1c8] sm:$0xff]   ;;  %v1376_v57 = vld [vmem:[#allocation3 + $0x150] sm:$0xff]   ;;  %v1380_v61 = vld [vmem:[#allocation3 + $0x158] sm:$0xff]  }
  0x44   :  { %1207 = vmatprep.subr.bf16.mxu1 %v1349_v19  ;;  %v1374_v56 = vld [vmem:[#allocation3 + $0x108] sm:$0xff]   ;;  %v1377_v59 = vld [vmem:[#allocation3 + $0x1d0] sm:$0xff]   ;;  %v1381_v63 = vld [vmem:[#allocation3 + $0x1d8] sm:$0xff]  }
  0x45   :  { %v1375_v58 = vld [vmem:[#allocation3 + $0x188] sm:$0xff]   ;;  %v1378_v60 = vld [vmem:[#allocation3 + $0x110] sm:$0xff]   ;;  %v1382_v0 = vld [vmem:[#allocation3 + $0x118] sm:$0xff]  }
  0x46   :  { %1186 = vmatpush3.bf16.msra.mxu0 %v1350_v20  ;;  %v1379_v62 = vld [vmem:[#allocation3 + $0x190] sm:$0xff]   ;;  %v1384_v1 = vld [vmem:[#allocation3 + $0x160] sm:$0xff]   ;;  %v1383_v2 = vld [vmem:[#allocation3 + $0x198] sm:$0xff]  }
  0x47   :  { %1208 = vmatpush3.bf16.msra.mxu1 %v1351_v21  ;;  %1187 = vmatprep.subr.bf16.mxu0 %v1352_v22  ;;  %v1385_v3 = vld [vmem:[#allocation3 + $0x1e0] sm:$0xff]   ;;  %v1388_v5 = vld [vmem:[#allocation3 + $0x168] sm:$0xff]   ;;  %v1392_v9 = vld [vmem:[#allocation3 + $0x170] sm:$0xff]   ;;  %v1521_v21 = vmov 0.0  }
  0x48   :  { %1209 = vmatprep.subr.bf16.mxu1 %v1353_v23  ;;  %v1386_v4 = vld [vmem:[#allocation3 + $0x120] sm:$0xff]   ;;  %v1389_v7 = vld [vmem:[#allocation3 + $0x1e8] sm:$0xff]   ;;  %v1393_v11 = vld [vmem:[#allocation3 + $0x1f0] sm:$0xff]  }
  0x49   :  { %v1387_v6 = vld [vmem:[#allocation3 + $0x1a0] sm:$0xff]   ;;  %v1390_v8 = vld [vmem:[#allocation3 + $0x128] sm:$0xff]   ;;  %v1394_v12 = vld [vmem:[#allocation3 + $0x130] sm:$0xff]  }
  0x4a   :  { %1188 = vmatpush3.bf16.msra.mxu0 %v1354_v24  ;;  %v1391_v10 = vld [vmem:[#allocation3 + $0x1a8] sm:$0xff]   ;;  %v1396_v14 = vld [vmem:[#allocation3 + $0x178] sm:$0xff]   ;;  %v1395_v15 = vld [vmem:[#allocation3 + $0x1b0] sm:$0xff]  }
  0x4b   :  { %1210 = vmatpush3.bf16.msra.mxu1 %v1355_v25  ;;  %1189 = vmatprep.subr.bf16.mxu0 %v1356_v26  ;;  %v1397_v17 = vld [vmem:[#allocation3 + $0x1f8] sm:$0xff]   ;;  %v1400_v20 = vld [vmem:[#allocation6] sm:$0xff]   ;;  %v1401_v22 = vld [vmem:[#allocation6 + $0x8] sm:$0xff]  }
  0x4c   :  { %1211 = vmatprep.subr.bf16.mxu1 %v1357_v27  ;;  %v1398_v18 = vld [vmem:[#allocation3 + $0x138] sm:$0xff]   ;;  %v1402_v23 = vld [vmem:[#allocation6 + $0x10] sm:$0xff]   ;;  %v1404_v25 = vld [vmem:[#allocation6 + $0x20] sm:$0xff]  }
  0x4d   :  { %v1399_v19 = vld [vmem:[#allocation3 + $0x1b8] sm:$0xff]   ;;  %v1405_v26 = vld [vmem:[#allocation6 + $0x28] sm:$0xff]   ;;  %v1406_v27 = vld [vmem:[#allocation6 + $0x30] sm:$0xff]  }
  0x4e   :  { %1190 = vmatpush3.bf16.msra.mxu0 %v1358_v28  ;;  %v1403_v24 = vld [vmem:[#allocation6 + $0x18] sm:$0xff]   ;;  %v1408_v28 = vld [vmem:[#allocation8] sm:$0xff]  }
  0x4f   :  { %1212 = vmatpush3.bf16.msra.mxu1 %v1359_v29  ;;  %1191 = vmatprep.subr.bf16.mxu0 %v1360_v30  ;;  %v1409_v29 = vld [vmem:[#allocation8 + $0x8] sm:$0xff]   ;;  %v1407_v30 = vld [vmem:[#allocation6 + $0x38] sm:$0xff]  }
  0x50   :  { %1213 = vmatprep.subr.bf16.mxu1 %v1361_v31  ;;  %v1410_v31 = vld [vmem:[#allocation8 + $0x10] sm:$0xff]  }
  0x52   :  { %1192 = vmatpush3.bf16.msra.mxu0 %v1362_v32  ;;  %v1411_v32 = vld [vmem:[#allocation8 + $0x18] sm:$0xff]  }
  0x53   :  { %1214 = vmatpush3.bf16.msra.mxu1 %v1363_v33  ;;  %1193 = vmatprep.subr.bf16.mxu0 %v1364_v34 }
  0x54   :  { %1215 = vmatprep.subr.bf16.mxu1 %v1365_v35 }
  0x56   :  { %1194 = vmatpush3.bf16.msra.mxu0 %v1366_v36 }
  0x57   :  { %1216 = vmatpush3.bf16.msra.mxu1 %v1367_v37  ;;  %1223 = vmatprep.subr.bf16.mxu0 %v1368_v38 }
  0x58   :  { %1245 = vmatprep.subr.bf16.mxu1 %v1369_v39 }
  0xba   :  { %v101_v46 = vpop.permute.xlu0 %100 }
  0xbb   :  { %v1621_v47 = vadd.s32 %v101_v46, %v1616_v43 }
  0xbd   :  { %vm104_vm3 = vcmp.lt.s32.totalorder %v76_v44, %v1621_v47  ;;  %vm106_vm5 = vcmp.lt.s32.totalorder %v78_v45, %v1621_v47  ;;  %vm103_vm9 = vcmp.lt.s32.totalorder %v1614_v42, %v1621_v47  ;;  %vm105_vm13 = vcmp.lt.s32.totalorder %v77_v48, %v1621_v47 }
  0xbe   :  { %vm112_vm6 = vmand %vm92_vm2, %vm104_vm3  ;;  %vm108_vm1 = vcmp.lt.s32.totalorder %v80_v49, %v1621_v47  ;;  %v827_v44 = vpop.permute.xlu0 %826 }
  0xbf   :  { %vm1145_vm7 = vmpackc.low %vm112_vm6, %vm112_vm6  ;;  %1416 = vrcp.f32 %v827_v44 }
  0xc0   :  { %1146 = vmatprep.mubr.msk.bf16.mxu0 %vm1145_vm7, %v1520_v50  ;;  %vm114_vm10 = vmand %vm94_vm4, %vm106_vm5  ;;  %vm98_vm4 = vcmp.ge.s32.totalorder %v82_v52, %v1616_v43  ;;  %vm110_vm5 = vcmp.lt.s32.totalorder %v82_v52, %v1621_v47 }
  0xc1   :  { %vm1149_vm11 = vmpackc.low %vm114_vm10, %vm114_vm10  ;;  %vm95_vm10 = vcmp.ge.s32.totalorder %v79_v13, %v1616_v43 }
  0xc2   :  { %1150 = vmatprep.mubr.msk.bf16.mxu1 %vm1149_vm11, %v1520_v50  ;;  %vm111_vm14 = vmand %vm91_vm8, %vm103_vm9  ;;  %vm107_vm11 = vcmp.lt.s32.totalorder %v79_v13, %v1621_v47 }
  0xc3   :  { %vm1147_vm15 = vmpackc.low %vm111_vm14, %vm111_vm14 }
  0xc4   :  { %1148 = vmatmul.mubr.msk.bf16.vlgmr.msra.gmra.mrb[0].mxu0 %vm1147_vm15, %v1520_v50  ;;  %vm113_vm2 = vmand %vm93_vm12, %vm105_vm13  ;;  %vm97_vm12 = vcmp.ge.s32.totalorder %v81_v16, %v1616_v43  ;;  %vm109_vm13 = vcmp.lt.s32.totalorder %v81_v16, %v1621_v47 }
  0xc5   :  { %vm1151_vm3 = vmpackc.low %vm113_vm2, %vm113_vm2  ;;  %1224 = vmatpush3.bf16.msra.mxu0 %v1370_v51  ;;  %vm1522_vm2 = vmmov 0  }
  0xc6   :  { %1152 = vmatmul.mubr.msk.bf16.vlgmr.msra.gmra.mrb[0].mxu1 %vm1151_vm3, %v1520_v50  ;;  %vm116_vm6 = vmand %vm96_vm0, %vm108_vm1  ;;  %1225 = vmatprep.subr.bf16.mxu0 %v1372_v53 }
  0xc7   :  { %1246 = vmatpush3.bf16.msra.mxu1 %v1371_v54  ;;  %vm1153_vm7 = vmpackc.low %vm116_vm6, %vm116_vm6 }
  0xc8   :  { %1154 = vmatprep.mubr.msk.bf16.mxu0 %vm1153_vm7, %v1520_v50  ;;  %vm118_vm8 = vmand %vm98_vm4, %vm110_vm5  ;;  %1247 = vmatprep.subr.bf16.mxu1 %v1373_v55 }
  0xc9   :  { %vm1157_vm9 = vmpackc.low %vm118_vm8, %vm118_vm8  ;;  %1226 = vmatpush3.bf16.msra.mxu0 %v1374_v56 }
  0xca   :  { %1158 = vmatprep.mubr.msk.bf16.mxu1 %vm1157_vm9, %v1520_v50  ;;  %1227 = vmatprep.subr.bf16.mxu0 %v1376_v57  ;;  %vm115_vm14 = vmand %vm95_vm10, %vm107_vm11  ;;  %v1417_v57 = vpop.eup %1416 }
  0xcb   :  { %1248 = vmatpush3.bf16.msra.mxu1 %v1375_v58  ;;  %vm117_vm15 = vmand %vm97_vm12, %vm109_vm13 }
  0xcc   :  { %1249 = vmatprep.subr.bf16.mxu1 %v1377_v59  ;;  %vm1155_vm0 = vmpackc.low %vm115_vm14, %vm115_vm14 }
  0xcd   :  { %1228 = vmatpush3.bf16.msra.mxu0 %v1378_v60  ;;  %vm1159_vm1 = vmpackc.low %vm117_vm15, %vm117_vm15  ;;  %v1412_v60 = vld [vmem:[#allocation8 + $0x20] sm:$0xff]  }
  0xce   :  { %1229 = vmatprep.subr.bf16.mxu0 %v1380_v61  ;;  %v1413_v61 = vld [vmem:[#allocation8 + $0x28] sm:$0xff]  }
  0xcf   :  { %1250 = vmatpush3.bf16.msra.mxu1 %v1379_v62  ;;  %v1414_v62 = vld [vmem:[#allocation8 + $0x30] sm:$0xff]  }
  0xd0   :  { %1251 = vmatprep.subr.bf16.mxu1 %v1381_v63  ;;  %v1415_v63 = vld [vmem:[#allocation8 + $0x38] sm:$0xff]  }
  0xd1   :  { %1230 = vmatpush3.bf16.msra.mxu0 %v1382_v0  ;;  %v1161_v0 = vld [vmem:[%s1693_s3] ss:$0 sm:$0xff]  ;;  %s1486_s3 = scalar_lea.vmem %s1064_s14, 128 }
  0xd2   :  { %1231 = vmatprep.subr.bf16.mxu0 %v1384_v1  ;;  %p1487_p10 = scmp.ne.s32.totalorder %s1064_s14, %s1486_s3  ;;  %p1492_p12 = scmp.lt.s32.totalorder %s1486_s3, %s1486_s3 }
  0xd3   :  { %1252 = vmatpush3.bf16.msra.mxu1 %v1383_v2 }
  0xd4   :  { %1253 = vmatprep.subr.bf16.mxu1 %v1385_v3  ;;  %p1493_p13 = por %p1492_p12, %p1491_p11 }
  0xd5   :  { %1232 = vmatpush3.bf16.msra.mxu0 %v1386_v4 }
  0xd6   :  { %1233 = vmatprep.subr.bf16.mxu0 %v1388_v5  ;;  %p1494_p0 = pnand %p1493_p13, %p1487_p10 }
  0xd7   :  { %1254 = vmatpush3.bf16.msra.mxu1 %v1387_v6 }
  0xd8   :  { %1255 = vmatprep.subr.bf16.mxu1 %v1389_v7 }
  0xd9   :  { %1234 = vmatpush3.bf16.msra.mxu0 %v1390_v8  ;;  %v1170_v8 = vld [vmem:[%s1695_s5] ss:$0 sm:$0xff] }
  0xda   :  { %1235 = vmatprep.subr.bf16.mxu0 %v1392_v9 }
  0xdb   :  { %1256 = vmatpush3.bf16.msra.mxu1 %v1391_v10 }
  0xdc   :  { %1257 = vmatprep.subr.bf16.mxu1 %v1393_v11 }
  0xdd   :  { %1236 = vmatpush3.bf16.msra.mxu0 %v1394_v12 }
  0xde   :  { %1237 = vmatprep.subr.bf16.mxu0 %v1396_v14 }
  0xdf   :  { %1258 = vmatpush3.bf16.msra.mxu1 %v1395_v15 }
  0xe0   :  { %1259 = vmatprep.subr.bf16.mxu1 %v1397_v17 }
  0xe1   :  { %1238 = vmatpush3.bf16.msra.mxu0 %v1398_v18 }
  0xe2   :  { %1285 = vmatprep.subr.bf16.mxu0 %v1521_v21 }
  0xe3   :  { %1260 = vmatpush3.bf16.msra.mxu1 %v1399_v19 }
  0xe4   :  { %1156 = vmatmul.mubr.msk.bf16.vlgmr.msra.gmra.mrb[4].mxu0 %vm1155_vm0, %v1520_v50  ;;  %1305 = vmatprep.subr.bf16.mxu1 %v1521_v21 }
  0xe5   :  { %1286 = vmatpush3.bf16.msra.mxu0 %v1400_v20  ;;  %1301 = vmatprep.mubr.msk.bf16.mxu0 %vm1522_vm2, %v1521_v21 }
  0xe6   :  { %1160 = vmatmul.mubr.msk.bf16.vlgmr.msra.gmra.mrb[4].mxu1 %vm1159_vm1, %v1520_v50  ;;  %1287 = vmatprep.subr.bf16.mxu0 %v1521_v21 }
  0xe7   :  { %1321 = vmatprep.mubr.msk.bf16.mxu1 %vm1522_vm2, %v1521_v21  ;;  %1306 = vmatpush3.bf16.msra.mxu1 %v1408_v28 }
  0xe8   :  { %1307 = vmatprep.subr.bf16.mxu1 %v1521_v21 }
  0xe9   :  { %1288 = vmatpush3.bf16.msra.mxu0 %v1401_v22 }
  0xea   :  { %1289 = vmatprep.subr.bf16.mxu0 %v1521_v21 }
  0xeb   :  { %1308 = vmatpush3.bf16.msra.mxu1 %v1409_v29 }
  0xec   :  { %1309 = vmatprep.subr.bf16.mxu1 %v1521_v21 }
  0xed   :  { %1290 = vmatpush3.bf16.msra.mxu0 %v1402_v23 }
  0xee   :  { %1291 = vmatprep.subr.bf16.mxu0 %v1521_v21 }
  0xef   :  { %1310 = vmatpush3.bf16.msra.mxu1 %v1410_v31 }
  0xf0   :  { %1311 = vmatprep.subr.bf16.mxu1 %v1521_v21 }
  0xf1   :  { %1292 = vmatpush3.bf16.msra.mxu0 %v1403_v24 }
  0xf2   :  { %1293 = vmatprep.subr.bf16.mxu0 %v1521_v21 }
  0xf3   :  { %1312 = vmatpush3.bf16.msra.mxu1 %v1411_v32 }
  0xf4   :  { %1313 = vmatprep.subr.bf16.mxu1 %v1521_v21 }
  0xf5   :  { %1294 = vmatpush3.bf16.msra.mxu0 %v1404_v25 }
  0xf6   :  { %1295 = vmatprep.subr.bf16.mxu0 %v1521_v21 }
  0xf7   :  { %1314 = vmatpush3.bf16.msra.mxu1 %v1412_v60 }
  0xf8   :  { %1315 = vmatprep.subr.bf16.mxu1 %v1521_v21 }
  0xf9   :  { %1296 = vmatpush3.bf16.msra.mxu0 %v1405_v26 }
  0xfa   :  { %1297 = vmatprep.subr.bf16.mxu0 %v1521_v21 }
  0xfb   :  { %1316 = vmatpush3.bf16.msra.mxu1 %v1413_v61 }
  0xfc   :  { %1317 = vmatprep.subr.bf16.mxu1 %v1521_v21 }
  0xfd   :  { %1298 = vmatpush3.bf16.msra.mxu0 %v1406_v27 }
  0xfe   :  { %1299 = vmatprep.subr.bf16.mxu0 %v1521_v21 }
  0xff   :  { %1318 = vmatpush3.bf16.msra.mxu1 %v1414_v62 }
 0x100   :  { %1319 = vmatprep.subr.bf16.mxu1 %v1521_v21 }
 0x101   :  { %1300 = vmatpush3.bf16.msra.mxu0 %v1407_v30 }
 0x103   :  { %1320 = vmatpush3.bf16.msra.mxu1 %v1415_v63 }
 0x197   :  { %v1195_v33 = vpop.f32.mrb[0].mxu0 }
 0x198   :  { %v1196_v34 = vpop.f32.mrb[1].mxu0 }
 0x199   :  { %v1217_v35 = vpop.f32.mrb[0].mxu1  ;;  %v1197_v36 = vadd.f32 %v1196_v34, %v1195_v33  ;;  %v1198_v37 = vpop.f32.mrb[2].mxu0 }
 0x19a   :  { %v1218_v38 = vpop.f32.mrb[1].mxu1  ;;  %v1199_v39 = vpop.f32.mrb[3].mxu0 }
 0x19b   :  { %v1219_v40 = vadd.f32 %v1218_v38, %v1217_v35  ;;  %v1220_v41 = vpop.f32.mrb[2].mxu1 }
 0x19c   :  { %v1221_v42 = vpop.f32.mrb[3].mxu1 }
 0x19d   :  { %v731_v43 = vadd.f32 %v1219_v40, %v1197_v36 }
 0x1b7   :  { %v1239_v45 = vpop.f32.mrb[4].mxu0 }
 0x1b8   :  { %v1240_v46 = vpop.f32.mrb[5].mxu0 }
 0x1b9   :  { %v1261_v47 = vpop.f32.mrb[4].mxu1  ;;  %v1241_v48 = vadd.f32 %v1240_v46, %v1239_v45  ;;  %v1242_v49 = vpop.f32.mrb[6].mxu0 }
 0x1ba   :  { %v1262_v50 = vpop.f32.mrb[5].mxu1  ;;  %v1243_v51 = vpop.f32.mrb[7].mxu0 }
 0x1bb   :  { %v771_v52 = vadd.f32 %v1241_v48, %v731_v43  ;;  %v1263_v53 = vadd.f32 %v1262_v50, %v1261_v47  ;;  %v1264_v54 = vpop.f32.mrb[6].mxu1 }
 0x1bc   :  { %v1265_v55 = vpop.f32.mrb[7].mxu1 }
 0x1bd   :  { %v811_v56 = vadd.f32 %v1263_v53, %v771_v52 }
 0x1bf   :  { %v830_v58 = vmul.f32 %v1417_v57, %v811_v56 }
 0x1c1   :  { %v831_v59 = vpack.c.bf16 %v830_v58, %v830_v58 }
 0x1c3   :  { %1302 = vmatmul.mubr.bf16.vlgmr.msra.gmra.mrb[8].mxu0 %v831_v59 }
 0x296   :  { %v937_v1 = vpop.f32.mrb[8].mxu0 }
 0x297   :  { %v938_v2 = vadd.f32 %v1161_v0, %v937_v1  ;;  %v1303_v3 = vpop.f32.mrb[9].mxu0 }
 0x298   :  { %v940_v4 = vpop.f32.mrb[10].mxu0 }
 0x299   :  { %1418 = vtanh.f32 %v938_v2  ;;  %v1304_v5 = vpop.f32.mrb[11].mxu0 }
 0x2a3   :  { %v1419_v6 = vpop.eup %1418 }
 0x2a4   :  { %v944_v7 = vpack.c.bf16 %v1419_v6, %v1419_v6 }
 0x2a6   :  { %1322 = vmatmul.mubr.bf16.vlgmr.msra.gmra.mrb[8].mxu1 %v944_v7 }
 0x379   :  { %v1050_v9 = vpop.f32.mrb[8].mxu1 }
 0x37a   :  { %v1051_v10 = vadd.f32 %v1170_v8, %v1050_v9  ;;  %v1323_v11 = vpop.f32.mrb[9].mxu1 }
 0x37b   :  { %v1053_v12 = vpop.f32.mrb[10].mxu1 }
 0x37c   :  { %1056 = vst [vmem:[#allocation9] sm:$0xff] %v1051_v10  ;;  %v1324_v13 = vpop.f32.mrb[11].mxu1 }
 0x37d   :  { %1497 = shalt.err (!%p1494_p0)
}
 0x37e   :  { %s1498_s5 = scalar_lea.hbm %s1696_s6, 128 }
 0x37f   :  { %p1499_p1 = scmp.ne.s32.totalorder %s1696_s6, %s1498_s5  ;;  %p1502_p2 = scmp.lt.u32.totalorder %s1498_s5, %s1696_s6 }
 0x381   :  { %p1504_p3 = pnand %p1502_p2, %p1499_p1 }
 0x383   :  { %1507 = shalt.err (!%p1504_p3)
}
 0x384   :  { %1066 = dma.vmem_to_hbm [thread:$0]  %s1064_s14, 128, %s1696_s6, [#allocation5]  }
 0x385   :  { %1512 = dma.done.wait [#allocation5], 128  }
 0x386   :  { %1513 = vsyncadd [#allocation5], 4294967168 }
 0x387   :  { %1070 = vsyncpa [#allocation4], 1 }
 0x388   :  { %1071 = vsyncpa [#allocation7], 1 }
 0x389   :  { %1072 = vsyncpa [#allocation5], 1 }

</bundles_post_ra>
